<compile_context>
chip_gen: v7x
topology: tpu7x:2x2x1
jax: 0.10.0
libtpu: 0.0.40
codegen_flags: <defaults>
</compile_context>

<pallas_src>
import math
from functools import partial

import jax
import jax.numpy as jnp
from jax.experimental import pallas as pl
from jax.experimental.pallas import tpu as pltpu


def _flash_attn_head_kernel(xq_ref, xkv_ref, wq_ref, wk_ref, wv_ref, out_ref,
                            q_sc, m_sc, l_sc, acc_sc):
    # xq_ref : (bt, tq, E)  query-row slab of x (block resident across kv axis)
    # xkv_ref: (bt, tk, E)  key/value-row slab of x
    # w*_ref : (E, H)       pre-transposed weights (W_q has the scale folded in)
    # out_ref: (bt, tq, H)  output tile (resident across the kv reduction axis)
    ki = pl.program_id(2)
    nk = pl.num_programs(2)

    bt, tq, E = xq_ref.shape
    tk = xkv_ref.shape[1]
    H = out_ref.shape[-1]

    # --- per (batch-tile, query-tile) init: project Q once, reset m/l/acc ----
    @pl.when(ki == 0)
    def _():
        xq = xq_ref[...].reshape(bt * tq, E)
        q = jnp.dot(xq, wq_ref[...], preferred_element_type=jnp.float32)
        q_sc[...] = q.reshape(bt, tq, H).astype(q_sc.dtype)
        m_sc[...] = jnp.full(m_sc.shape, -jnp.inf, dtype=m_sc.dtype)
        l_sc[...] = jnp.zeros(l_sc.shape, dtype=l_sc.dtype)
        acc_sc[...] = jnp.zeros(acc_sc.shape, dtype=acc_sc.dtype)

    # --- K/V projection for this kv tile (fused; bf16 MXU, f32 accumulate) ---
    xkv = xkv_ref[...].reshape(bt * tk, E)
    k = jnp.dot(xkv, wk_ref[...], preferred_element_type=jnp.float32)
    v = jnp.dot(xkv, wv_ref[...], preferred_element_type=jnp.float32)
    k = k.reshape(bt, tk, H).astype(xkv_ref.dtype)
    v = v.reshape(bt, tk, H).astype(xkv_ref.dtype)

    # --- scores: contract on the head dim of both operands (no explicit k.T) -
    s = jnp.einsum('bqd,bkd->bqk', q_sc[...], k,
                   preferred_element_type=jnp.float32)        # (bt, tq, tk) f32

    # --- online softmax, all statistics in f32 -------------------------------
    m_prev = m_sc[...]
    m_new = jnp.maximum(m_prev, jnp.max(s, axis=-1, keepdims=True))
    alpha = jnp.exp(m_prev - m_new)
    p = jnp.exp(s - m_new)
    l_sc[...] = alpha * l_sc[...] + jnp.sum(p, axis=-1, keepdims=True)
    acc_sc[...] = alpha * acc_sc[...] + jnp.einsum(
        'bqk,bkd->bqd', p.astype(v.dtype), v,
        preferred_element_type=jnp.float32)
    m_sc[...] = m_new

    # --- finalize: exact normalization, single writeback of the output tile --
    @pl.when(ki == nk - 1)
    def _():
        # dropout p = 0.0 -> identity.
        out = acc_sc[...] * (1.0 / l_sc[...])     # exact divide on (bt, tq, 1)
        out_ref[...] = out.astype(out_ref.dtype)


@partial(jax.jit,
         static_argnames=("batch_tile", "q_tile", "k_tile", "compute_dtype"))
def attention_head(x, w_key, w_query, w_value, *,
                   batch_tile=None, q_tile=256, k_tile=256,
                   compute_dtype=jnp.bfloat16):
    """x: (B, T, E); w_*: (head_size, E) -- PyTorch nn.Linear (out, in) layout.
    Returns (B, T, head_size) in x.dtype."""
    B, T, E = x.shape
    H = w_key.shape[0]

    # ---- tile selection (shapes are static under jit) -----------------------
    if batch_tile is None:
        batch_tile = max(1, B // 2)    # >= 2 parallel batch steps for v7x megacore
    bt = max(1, min(batch_tile, B))
    while B % bt:
        bt -= 1
    tq = max(1, min(q_tile, T))
    while T % tq:
        tq -= 1
    tk = max(1, min(k_tile, T))
    while T % tk:
        tk -= 1

    # ---- weight prep (inside jit -> compiled once, not per eager call) ------
    scale = H ** (-0.5)
    wq = (w_query.T * scale).astype(compute_dtype)   # scale folded into W_q
    wk = w_key.T.astype(compute_dtype)
    wv = w_value.T.astype(compute_dtype)
    x_c = x.astype(compute_dtype)

    in_itm = jnp.dtype(compute_dtype).itemsize
    out_itm = jnp.dtype(x.dtype).itemsize

    # ---- advisory cost estimate ---------------------------------------------
    flops = (2 * B * T * E * H                        # Q projection
             + 2 * B * T * E * H * 2 * (T // tq)      # K/V proj (per query tile)
             + 4 * B * T * T * H)                     # scores + weighted sum
    cost = pl.CostEstimate(
        flops=flops,
        transcendentals=B * T * T,
        bytes_accessed=(B * T * E * in_itm * (1 + T // tq)
                        + 3 * E * H * in_itm
                        + B * T * H * out_itm))

    # ---- explicit VMEM budget (rough, 2x margin; respects v7x's 64 MiB) -----
    def _pad(n, m):
        return ((n + m - 1) // m) * m
    lane = 128
    est = (2 * bt * _pad(tq, 16) * _pad(E, lane) * in_itm      # xq (dbl-buffered)
           + 2 * bt * _pad(tk, 16) * _pad(E, lane) * in_itm    # xkv
           + 2 * bt * _pad(tq, 16) * _pad(H, lane) * out_itm   # out
           + 2 * 3 * _pad(E, 16) * _pad(H, lane) * in_itm      # weights
           + bt * _pad(tq, 8) * _pad(H, lane) * (in_itm + 4)   # q_sc + acc_sc
           + 2 * bt * _pad(tq, 8) * lane * 4                   # m, l
           + 4 * bt * _pad(tq, 8) * _pad(tk, lane) * 4)        # s/p temporaries
    vmem_limit = int(min(48 * 2**20, max(16 * 2**20, 2 * est)))

    grid = (B // bt, T // tq, T // tk)
    grid_spec = pltpu.PrefetchScalarGridSpec(
        num_scalar_prefetch=0,
        grid=grid,
        in_specs=[
            pl.BlockSpec((bt, tq, E), lambda b, qi, ki: (b, qi, 0)),  # query rows
            pl.BlockSpec((bt, tk, E), lambda b, qi, ki: (b, ki, 0)),  # kv rows
            pl.BlockSpec((E, H), lambda b, qi, ki: (0, 0)),           # W_q (resident)
            pl.BlockSpec((E, H), lambda b, qi, ki: (0, 0)),           # W_k (resident)
            pl.BlockSpec((E, H), lambda b, qi, ki: (0, 0)),           # W_v (resident)
        ],
        out_specs=pl.BlockSpec((bt, tq, H), lambda b, qi, ki: (b, qi, 0)),
        scratch_shapes=[
            pltpu.VMEM((bt, tq, H), compute_dtype),   # Q for this query tile
            pltpu.VMEM((bt, tq, 1), jnp.float32),     # running max
            pltpu.VMEM((bt, tq, 1), jnp.float32),     # running denominator
            pltpu.VMEM((bt, tq, H), jnp.float32),     # output accumulator
        ],
    )

    return pl.pallas_call(
        _flash_attn_head_kernel,
        out_shape=jax.ShapeDtypeStruct((B, T, H), x.dtype),
        grid_spec=grid_spec,
        compiler_params=pltpu.CompilerParams(
            dimension_semantics=("parallel", "parallel", "arbitrary"),
            vmem_limit_bytes=vmem_limit,
        ),
        cost_estimate=cost,
    )(x_c, x_c, wq, wk, wv)


def _reference(x, w_key, w_query, w_value):
    # Pure-JAX mirror of the PyTorch forward.
    k = x @ w_key.T
    q = x @ w_query.T
    v = x @ w_value.T
    wei = (q @ jnp.swapaxes(k, -2, -1)) * (k.shape[-1] ** (-0.5))
    wei = jax.nn.softmax(wei, axis=-1)
    return wei @ v


if __name__ == "__main__":
    # Small shapes consistent with the module: batch=2, seq=16, n_embd=32, head_size=16.
    B, T, E, H = 2, 16, 32, 16

    key = jax.random.PRNGKey(0)
    k_x, k_wk, k_wq, k_wv = jax.random.split(key, 4)
    x = jax.random.normal(k_x, (B, T, E), dtype=jnp.float32)

    # nn.Linear(n_embd, head_size, bias=False) -> weight (head_size, n_embd),
    # uniform(-1/sqrt(in), 1/sqrt(in)) like torch's default init.
    bound = 1.0 / math.sqrt(E)
    w_key_p = jax.random.uniform(k_wk, (H, E), minval=-bound, maxval=bound, dtype=jnp.float32)
    w_query_p = jax.random.uniform(k_wq, (H, E), minval=-bound, maxval=bound, dtype=jnp.float32)
    w_value_p = jax.random.uniform(k_wv, (H, E), minval=-bound, maxval=bound, dtype=jnp.float32)

    ref = _reference(x, w_key_p, w_query_p, w_value_p)

    # 1) f32 compute with small q/k tiles: exercises the full 3-D grid and the
    #    online-softmax accumulate/finalize path; tight tolerance.
    out_exact = attention_head(x, w_key_p, w_query_p, w_value_p,
                               q_tile=8, k_tile=8, compute_dtype=jnp.float32)
    out_exact = jax.block_until_ready(out_exact)
    assert out_exact.shape == (B, T, H)
    assert jnp.allclose(out_exact, ref, atol=2e-3, rtol=2e-3), \
        float(jnp.max(jnp.abs(out_exact - ref)))

    # 2) Production path: bf16 operands, f32 accumulation, default tiles.
    out_bf16 = attention_head(x, w_key_p, w_query_p, w_value_p)
    out_bf16 = jax.block_until_ready(out_bf16)
    assert out_bf16.shape == (B, T, H)
    assert jnp.allclose(out_bf16, ref, atol=5e-2, rtol=5e-2), \
        float(jnp.max(jnp.abs(out_bf16 - ref)))

    print("KERNEL_OK")
</pallas_src>

<mosaic_0001>
module attributes {stable_mosaic.version = 11 : i64} {
  func.func @_flash_attn_head_kernel(%arg0: i32, %arg1: i32, %arg2: i32, %arg3: memref<1x8x32xf32, #tpu.memory_space<vmem>>, %arg4: memref<1x8x32xf32, #tpu.memory_space<vmem>>, %arg5: memref<32x16xf32, #tpu.memory_space<vmem>>, %arg6: memref<32x16xf32, #tpu.memory_space<vmem>>, %arg7: memref<32x16xf32, #tpu.memory_space<vmem>>, %arg8: memref<1x8x16xf32, #tpu.memory_space<vmem>>, %arg9: memref<1x8x16xf32, #tpu.memory_space<vmem>>, %arg10: memref<1x8x1xf32, #tpu.memory_space<vmem>>, %arg11: memref<1x8x1xf32, #tpu.memory_space<vmem>>, %arg12: memref<1x8x16xf32, #tpu.memory_space<vmem>>) attributes {dimension_semantics = [#tpu.dimension_semantics<parallel>, #tpu.dimension_semantics<parallel>, #tpu.dimension_semantics<arbitrary>], iteration_bounds = array<i64: 2, 2, 2>, scalar_prefetch = 0 : i64, scratch_operands = 4 : i64, tpu.core_type = #tpu.core_type<tc>, window_params = [{transform_indices = @transform_0, window_bounds = array<i64: 1, 8, 32>}, {transform_indices = @transform_1, window_bounds = array<i64: 1, 8, 32>}, {pipeline_mode = #tpu.pipeline_mode<synchronous>, transform_indices = @transform_2, window_bounds = array<i64: 32, 16>}, {pipeline_mode = #tpu.pipeline_mode<synchronous>, transform_indices = @transform_3, window_bounds = array<i64: 32, 16>}, {pipeline_mode = #tpu.pipeline_mode<synchronous>, transform_indices = @transform_4, window_bounds = array<i64: 32, 16>}, {transform_indices = @transform_5, window_bounds = array<i64: 1, 8, 16>}]} {
    %c0_i32 = arith.constant 0 : i32
    %0 = arith.cmpi eq, %arg2, %c0_i32 : i32
    %1 = arith.extui %0 : i1 to i32
    %c0_i32_0 = arith.constant 0 : i32
    %2 = arith.cmpi ne, %1, %c0_i32_0 : i32
    scf.if %2 {
      %c0_34 = arith.constant 0 : index
      %c0_35 = arith.constant 0 : index
      %c0_36 = arith.constant 0 : index
      %38 = vector.load %arg3[%c0_34, %c0_35, %c0_36] : memref<1x8x32xf32, #tpu.memory_space<vmem>>, vector<1x8x32xf32>
      %39 = vector.shape_cast %38 : vector<1x8x32xf32> to vector<8x32xf32>
      %c0_37 = arith.constant 0 : index
      %c0_38 = arith.constant 0 : index
      %40 = vector.load %arg5[%c0_37, %c0_38] : memref<32x16xf32, #tpu.memory_space<vmem>>, vector<32x16xf32>
      %cst_39 = arith.constant dense<0.000000e+00> : vector<8x16xf32>
      %41 = tpu.matmul %39, %40, %cst_39 {dimension_numbers = #tpu.dot_dimension_numbers<[1], [0], [0], [1], [0, 0, 1, 1], [], []>} : vector<8x32xf32>, vector<32x16xf32>, vector<8x16xf32> -> vector<8x16xf32>
      %42 = vector.shape_cast %41 : vector<8x16xf32> to vector<1x8x16xf32>
      %c0_40 = arith.constant 0 : index
      %c0_41 = arith.constant 0 : index
      %c0_42 = arith.constant 0 : index
      %43 = vector.load %arg9[%c0_40, %c0_41, %c0_42] : memref<1x8x16xf32, #tpu.memory_space<vmem>>, vector<1x8x16xf32>
      tpu.vector_store %arg9[%c0_40, %c0_41, %c0_42], %42 {strides = array<i32>} : memref<1x8x16xf32, #tpu.memory_space<vmem>>, vector<1x8x16xf32>,
      %cst_43 = arith.constant 0xFF800000 : f32
      %44 = vector.broadcast %cst_43 : f32 to vector<1x8x1xf32>
      %c0_44 = arith.constant 0 : index
      %c0_45 = arith.constant 0 : index
      %c0_46 = arith.constant 0 : index
      %45 = vector.load %arg10[%c0_44, %c0_45, %c0_46] : memref<1x8x1xf32, #tpu.memory_space<vmem>>, vector<1x8x1xf32>
      tpu.vector_store %arg10[%c0_44, %c0_45, %c0_46], %44 {strides = array<i32>} : memref<1x8x1xf32, #tpu.memory_space<vmem>>, vector<1x8x1xf32>,
      %cst_47 = arith.constant 0.000000e+00 : f32
      %46 = vector.broadcast %cst_47 : f32 to vector<1x8x1xf32>
      %c0_48 = arith.constant 0 : index
      %c0_49 = arith.constant 0 : index
      %c0_50 = arith.constant 0 : index
      %47 = vector.load %arg11[%c0_48, %c0_49, %c0_50] : memref<1x8x1xf32, #tpu.memory_space<vmem>>, vector<1x8x1xf32>
      tpu.vector_store %arg11[%c0_48, %c0_49, %c0_50], %46 {strides = array<i32>} : memref<1x8x1xf32, #tpu.memory_space<vmem>>, vector<1x8x1xf32>,
      %cst_51 = arith.constant 0.000000e+00 : f32
      %48 = vector.broadcast %cst_51 : f32 to vector<1x8x16xf32>
      %c0_52 = arith.constant 0 : index
      %c0_53 = arith.constant 0 : index
      %c0_54 = arith.constant 0 : index
      %49 = vector.load %arg12[%c0_52, %c0_53, %c0_54] : memref<1x8x16xf32, #tpu.memory_space<vmem>>, vector<1x8x16xf32>
      tpu.vector_store %arg12[%c0_52, %c0_53, %c0_54], %48 {strides = array<i32>} : memref<1x8x16xf32, #tpu.memory_space<vmem>>, vector<1x8x16xf32>,
    } else {
    }
    %c0 = arith.constant 0 : index
    %c0_1 = arith.constant 0 : index
    %c0_2 = arith.constant 0 : index
    %3 = vector.load %arg4[%c0, %c0_1, %c0_2] : memref<1x8x32xf32, #tpu.memory_space<vmem>>, vector<1x8x32xf32>
    %4 = vector.shape_cast %3 : vector<1x8x32xf32> to vector<8x32xf32>
    %c0_3 = arith.constant 0 : index
    %c0_4 = arith.constant 0 : index
    %5 = vector.load %arg6[%c0_3, %c0_4] : memref<32x16xf32, #tpu.memory_space<vmem>>, vector<32x16xf32>
    %cst = arith.constant dense<0.000000e+00> : vector<8x16xf32>
    %6 = tpu.matmul %4, %5, %cst {dimension_numbers = #tpu.dot_dimension_numbers<[1], [0], [0], [1], [0, 0, 1, 1], [], []>} : vector<8x32xf32>, vector<32x16xf32>, vector<8x16xf32> -> vector<8x16xf32>
    %c0_5 = arith.constant 0 : index
    %c0_6 = arith.constant 0 : index
    %7 = vector.load %arg7[%c0_5, %c0_6] : memref<32x16xf32, #tpu.memory_space<vmem>>, vector<32x16xf32>
    %cst_7 = arith.constant dense<0.000000e+00> : vector<8x16xf32>
    %8 = tpu.matmul %4, %7, %cst_7 {dimension_numbers = #tpu.dot_dimension_numbers<[1], [0], [0], [1], [0, 0, 1, 1], [], []>} : vector<8x32xf32>, vector<32x16xf32>, vector<8x16xf32> -> vector<8x16xf32>
    %9 = vector.shape_cast %6 : vector<8x16xf32> to vector<1x8x16xf32>
    %10 = vector.shape_cast %8 : vector<8x16xf32> to vector<1x8x16xf32>
    %c0_8 = arith.constant 0 : index
    %c0_9 = arith.constant 0 : index
    %c0_10 = arith.constant 0 : index
    %11 = vector.load %arg9[%c0_8, %c0_9, %c0_10] : memref<1x8x16xf32, #tpu.memory_space<vmem>>, vector<1x8x16xf32>
    "tpu.trace_start"() <{level = 10 : i32, message = "bqd,bkd->bqk"}> : () -> ()
    %cst_11 = arith.constant dense<0.000000e+00> : vector<1x8x8xf32>
    %12 = tpu.matmul %11, %9, %cst_11 {dimension_numbers = #tpu.dot_dimension_numbers<[2], [2], [1], [1], [0, 0, 0, 1, 1, 1], [0], [0]>} : vector<1x8x16xf32>, vector<1x8x16xf32>, vector<1x8x8xf32> -> vector<1x8x8xf32>
    "tpu.trace_stop"() : () -> ()
    %c0_12 = arith.constant 0 : index
    %c0_13 = arith.constant 0 : index
    %c0_14 = arith.constant 0 : index
    %13 = vector.load %arg10[%c0_12, %c0_13, %c0_14] : memref<1x8x1xf32, #tpu.memory_space<vmem>>, vector<1x8x1xf32>
    %cst_15 = arith.constant dense<0xFF800000> : vector<1x8xf32>
    %14 = vector.multi_reduction <maximumf>, %12, %cst_15 [2] : vector<1x8x8xf32> to vector<1x8xf32>
    %15 = vector.shape_cast %14 : vector<1x8xf32> to vector<1x8x1xf32>
    %16 = arith.maximumf %13, %15 : vector<1x8x1xf32>
    %17 = arith.subf %13, %16 : vector<1x8x1xf32>
    %18 = math.exp %17 : vector<1x8x1xf32>
    %19 = vector.broadcast %16 : vector<1x8x1xf32> to vector<1x8x8xf32>
    %20 = arith.subf %12, %19 : vector<1x8x8xf32>
    %21 = math.exp %20 : vector<1x8x8xf32>
    %c0_16 = arith.constant 0 : index
    %c0_17 = arith.constant 0 : index
    %c0_18 = arith.constant 0 : index
    %22 = vector.load %arg11[%c0_16, %c0_17, %c0_18] : memref<1x8x1xf32, #tpu.memory_space<vmem>>, vector<1x8x1xf32>
    %23 = arith.mulf %18, %22 : vector<1x8x1xf32>
    %cst_19 = arith.constant dense<0.000000e+00> : vector<1x8xf32>
    %24 = vector.multi_reduction <add>, %21, %cst_19 [2] : vector<1x8x8xf32> to vector<1x8xf32>
    %25 = vector.shape_cast %24 : vector<1x8xf32> to vector<1x8x1xf32>
    %26 = arith.addf %23, %25 : vector<1x8x1xf32>
    %c0_20 = arith.constant 0 : index
    %c0_21 = arith.constant 0 : index
    %c0_22 = arith.constant 0 : index
    %27 = vector.load %arg11[%c0_20, %c0_21, %c0_22] : memref<1x8x1xf32, #tpu.memory_space<vmem>>, vector<1x8x1xf32>
    tpu.vector_store %arg11[%c0_20, %c0_21, %c0_22], %26 {strides = array<i32>} : memref<1x8x1xf32, #tpu.memory_space<vmem>>, vector<1x8x1xf32>,
    %c0_23 = arith.constant 0 : index
    %c0_24 = arith.constant 0 : index
    %c0_25 = arith.constant 0 : index
    %28 = vector.load %arg12[%c0_23, %c0_24, %c0_25] : memref<1x8x16xf32, #tpu.memory_space<vmem>>, vector<1x8x16xf32>
    %29 = vector.broadcast %18 : vector<1x8x1xf32> to vector<1x8x16xf32>
    %30 = arith.mulf %29, %28 : vector<1x8x16xf32>
    "tpu.trace_start"() <{level = 10 : i32, message = "bqk,bkd->bqd"}> : () -> ()
    %cst_26 = arith.constant dense<0.000000e+00> : vector<1x8x16xf32>
    %31 = tpu.matmul %21, %10, %cst_26 {dimension_numbers = #tpu.dot_dimension_numbers<[2], [1], [1], [2], [0, 0, 0, 1, 1, 2], [0], [0]>} : vector<1x8x8xf32>, vector<1x8x16xf32>, vector<1x8x16xf32> -> vector<1x8x16xf32>
    "tpu.trace_stop"() : () -> ()
    %32 = arith.addf %30, %31 : vector<1x8x16xf32>
    %c0_27 = arith.constant 0 : index
    %c0_28 = arith.constant 0 : index
    %c0_29 = arith.constant 0 : index
    %33 = vector.load %arg12[%c0_27, %c0_28, %c0_29] : memref<1x8x16xf32, #tpu.memory_space<vmem>>, vector<1x8x16xf32>
    tpu.vector_store %arg12[%c0_27, %c0_28, %c0_29], %32 {strides = array<i32>} : memref<1x8x16xf32, #tpu.memory_space<vmem>>, vector<1x8x16xf32>,
    %c0_30 = arith.constant 0 : index
    %c0_31 = arith.constant 0 : index
    %c0_32 = arith.constant 0 : index
    %34 = vector.load %arg10[%c0_30, %c0_31, %c0_32] : memref<1x8x1xf32, #tpu.memory_space<vmem>>, vector<1x8x1xf32>
    tpu.vector_store %arg10[%c0_30, %c0_31, %c0_32], %16 {strides = array<i32>} : memref<1x8x1xf32, #tpu.memory_space<vmem>>, vector<1x8x1xf32>,
    %c1_i32 = arith.constant 1 : i32
    %35 = arith.cmpi eq, %arg2, %c1_i32 : i32
    %36 = arith.extui %35 : i1 to i32
    %c0_i32_33 = arith.constant 0 : i32
    %37 = arith.cmpi ne, %36, %c0_i32_33 : i32
    scf.if %37 {
      %c0_34 = arith.constant 0 : index
      %c0_35 = arith.constant 0 : index
      %c0_36 = arith.constant 0 : index
      %38 = vector.load %arg12[%c0_34, %c0_35, %c0_36] : memref<1x8x16xf32, #tpu.memory_space<vmem>>, vector<1x8x16xf32>
      %c0_37 = arith.constant 0 : index
      %c0_38 = arith.constant 0 : index
      %c0_39 = arith.constant 0 : index
      %39 = vector.load %arg11[%c0_37, %c0_38, %c0_39] : memref<1x8x1xf32, #tpu.memory_space<vmem>>, vector<1x8x1xf32>
      %cst_40 = arith.constant 1.000000e+00 : f32
      %40 = vector.broadcast %cst_40 : f32 to vector<1x8x1xf32>
      %41 = arith.divf %40, %39 : vector<1x8x1xf32>
      %42 = vector.broadcast %41 : vector<1x8x1xf32> to vector<1x8x16xf32>
      %43 = arith.mulf %38, %42 : vector<1x8x16xf32>
      %c0_41 = arith.constant 0 : index
      %c0_42 = arith.constant 0 : index
      %c0_43 = arith.constant 0 : index
      %44 = vector.load %arg8[%c0_41, %c0_42, %c0_43] : memref<1x8x16xf32, #tpu.memory_space<vmem>>, vector<1x8x16xf32>
      tpu.vector_store %arg8[%c0_41, %c0_42, %c0_43], %43 {strides = array<i32>} : memref<1x8x16xf32, #tpu.memory_space<vmem>>, vector<1x8x16xf32>,
    } else {
    }
    return
  }
  func.func @transform_0(%arg0: i32, %arg1: i32, %arg2: i32) -> (i32, i32, i32) {
    %c0_i32 = arith.constant 0 : i32
    %c0_i32_0 = arith.constant 0 : i32
    return %arg0, %arg1, %c0_i32 : i32, i32, i32
  }
  func.func @transform_1(%arg0: i32, %arg1: i32, %arg2: i32) -> (i32, i32, i32) {
    %c0_i32 = arith.constant 0 : i32
    %c0_i32_0 = arith.constant 0 : i32
    return %arg0, %arg2, %c0_i32 : i32, i32, i32
  }
  func.func @transform_2(%arg0: i32, %arg1: i32, %arg2: i32) -> (i32, i32) {
    %c0_i32 = arith.constant 0 : i32
    %c0_i32_0 = arith.constant 0 : i32
    %c0_i32_1 = arith.constant 0 : i32
    return %c0_i32, %c0_i32_0 : i32, i32
  }
  func.func @transform_3(%arg0: i32, %arg1: i32, %arg2: i32) -> (i32, i32) {
    %c0_i32 = arith.constant 0 : i32
    %c0_i32_0 = arith.constant 0 : i32
    %c0_i32_1 = arith.constant 0 : i32
    return %c0_i32, %c0_i32_0 : i32, i32
  }
  func.func @transform_4(%arg0: i32, %arg1: i32, %arg2: i32) -> (i32, i32) {
    %c0_i32 = arith.constant 0 : i32
    %c0_i32_0 = arith.constant 0 : i32
    %c0_i32_1 = arith.constant 0 : i32
    return %c0_i32, %c0_i32_0 : i32, i32
  }
  func.func @transform_5(%arg0: i32, %arg1: i32, %arg2: i32) -> (i32, i32, i32) {
    %c0_i32 = arith.constant 0 : i32
    %c0_i32_0 = arith.constant 0 : i32
    return %arg0, %arg1, %c0_i32 : i32, i32, i32
  }
}

</mosaic_0001>

<bundles_post_ra>
// kernel: attention_head.1
= control target key start
LH: loop header
LB: loop body
LE: loop exit
PB: predicated region body
PF: predicated region fallthrough
CT: control target
= control target key end

     0   :  { %10 = vsyncpa [#allocation7], 0  ;;  %s1429_s0 = inlined_call_operand.vmem [shape: f32[2,16,32], index: 0, kind: input, shape index: {}, may-alias: {0,1}]   ;;  %s1430_s1 = inlined_call_operand.vmem [shape: f32[2,16,32], index: 1, kind: input, shape index: {}, may-alias: {0,1}]   ;;  %s1431_s2 = inlined_call_operand.vmem [shape: f32[32,16], index: 2, kind: input, shape index: {}]   ;;  %s1432_s3 = inlined_call_operand.vmem [shape: f32[32,16], index: 3, kind: input, shape index: {}]   ;;  %s1433_s4 = inlined_call_operand.vmem [shape: f32[32,16], index: 4, kind: input, shape index: {}]   ;;  %s1434_s5 = inlined_call_operand.hbm [shape: f32[2,16,16], index: 5, kind: output, shape index: {}]  }
   0x1   :  { %12 = vsyncpa [#allocation7 + $0x1], 0  ;;  %s1207_s18 = smov 0   ;;  %s1209_s19 = smov 0  }
   0x2   :  { %s1211_s20 = smov 0   ;;  %s1213_s21 = smov 0  }
   0x3   :  { %s1215_s22 = smov 0   ;;  %s1217_s23 = smov 0  }
   0x4   :  { %s1219_s24 = smov 0   ;;  %s1221_s25 = smov 0  }
   0x5   :  { %s1223_s26 = smov 0   ;;  %s1225_s27 = smov 0  }
   0x6 LB: > { %1442 = sst [smem:[#allocation9_spill]] %s1137_s20  ;;  %s847_s28 = sadd.s32 4294967295, %s1165_s27   ;;  %s1165_s27 = sphi %s1225_s27, %s18_s27   ;;  %s1161_s26 = sphi %s1223_s26, %s1463_s26   ;;  %s1157_s25 = sphi %s1221_s25, %s1459_s25   ;;  %s1153_s24 = sphi %s1219_s24, %s1458_s24   ;;  %s1149_s23 = sphi %s1217_s23, %s1457_s23   ;;  %s1145_s22 = sphi %s1215_s22, %s1456_s22   ;;  %s1141_s21 = sphi %s1213_s21, %s1455_s21   ;;  %s1137_s20 = sphi %s1211_s20, %s1454_s20   ;;  %s1133_s19 = sphi %s1209_s19, %s1462_s19   ;;  %s1129_s18 = sphi %s1207_s18, %s1461_s18  }
   0x7   : > { %1443 = sst [smem:[#allocation10_spill]] %s1153_s24  ;;  %s848_s29 = sadd.s32 4294967294, %s1165_s27  }
   0x8   : > { %1444 = sst [smem:[#allocation11_spill]] %s1157_s25  ;;  %s30_s30 = sadd.s32 1, %s1153_s24 }
   0x9   : > { %1445 = sst [smem:[#allocation12_spill]] %s1161_s26  ;;  %p31_p0 = scmp.ge.s32.totalorder %s30_s30, 2 }
   0xa   : > { %s33_s6 = sadd.s32 1, %s1157_s25  ;;  %s37_s7 = sadd.s32 1, %s1161_s26 }
   0xb   : > { %p175_p1 = scmp.ne.s32.totalorder %s1137_s20, %s1133_s19  ;;  %s1465_s30 = smov (%p31_p0, %s30_s30), 0 }
   0xc   : > { %1446 = sst [smem:[#allocation13_spill]] %s1465_s30  ;;  %s1467_s6 = smov (!%p31_p0, %s33_s6), %s1157_s25 }
   0xd   : > { %p176_p2 = scmp.eq.s32.totalorder %s847_s28, 7  ;;  %p181_p3 = scmp.ne.s32.totalorder %s1133_s19, %s1129_s18 }
   0xe   : > { %p35_p4 = scmp.ge.s32.totalorder %s1467_s6, 2  ;;  %p182_p5 = scmp.eq.s32.totalorder %s848_s29, 7 }
   0xf   : > { %p1269_p6 = por %p176_p2, %p175_p1  ;;  %p851_p8 = scmp.ge.s32.totalorder %s1165_s27, 1 }
  0x10   : > { %s1469_s6 = smov (%p35_p4, %s1467_s6), 0  ;;  %s1471_s7 = smov (!%p35_p4, %s37_s7), %s1161_s26 }
  0x11   : > { %1448 = sst [smem:[#allocation14_spill]] %s1469_s6  ;;  %p1276_p7 = por %p182_p5, %p181_p3 }
  0x12   : > { %p39_p9 = scmp.ge.s32.totalorder %s1471_s7, 2  ;;  %p231_p10 = scmp.lt.s32.totalorder %s1165_s27, 9 }
  0x13   : > { %s161_s10 = ssub.s32 %s1157_s25, %s1469_s6  ;;  %s165_s13 = sadd.s32 1, %s1137_s20 }
  0x14   : > { %s1473_s7 = smov (%p39_p9, %s1471_s7), 0  ;;  %p232_p11 = pnand %p851_p8, %p231_p10 }
  0x15   : > { %1450 = sst [smem:[#allocation15_spill]] %s1473_s7  ;;  %s160_s11 = ssub.s32 %s1161_s26, %s1473_s7 }
  0x16   : > { %s162_s12 = sor.u32 %s161_s10, %s160_s11  ;;  %235 = sbr.rel (%p232_p11) target bundleno = 1300 (0x514), region = 40 }
  0x17   : > { %p163_p12 = scmp.eq.s32.totalorder %s162_s12, 0  ;;  %s1440_s15 = sand.u32 (!%p232_p11), 1, %s1133_s19  }
  0x18   : > { %p270_p13 = scmp.lt.s32.totalorder (!%p232_p11), %s1149_s23, 1  ;;  %s1296_s16 = sshll.u32 (!%p232_p11), %s1440_s15, 3 }
  0x19   : > { %s1290_s14 = scalar_select %p163_p12, %s1137_s20, %s165_s13  }
  0x1a   : > { %p272_p0 = scmp.lt.s32.totalorder (!%p232_p11), %s1145_s22, 1  ;;  %p280_p1 = scmp.lt.s32.totalorder (!%p232_p11), %s1141_s21, 1 }
  0x1b   : > { %1451 = sst [smem:[#allocation16_spill]] %s1290_s14  ;;  %s269_s14 = scalar_lea.vmem (!%p232_p11), [#allocation6], %s1296_s16 }
  0x1c   : > { %p857_p2 = scmp.ne.s32.totalorder (!%p232_p11), %s1141_s21, 0 }
  0x1d   : > { %s271_s17 = scalar_select %p270_p13, %s1149_s23, 1 }
  0x1e   : > { %s273_s28 = scalar_select %p272_p0, %s1145_s22, 1 }
  0x1f   : > { %s853_s29 = sshll.u32 %s271_s17, 1  ;;  %v291_v0 = vld [vmem:[%s1431_s2] sm:$0xff] (!%p857_p2)  ;;  %v292_v1 = vld [vmem:[%s1431_s2 + $0x8] sm:$0xff] (!%p857_p2)  ;;  %v293_v2 = vld [vmem:[%s1431_s2 + $0x10] sm:$0xff] (!%p857_p2)  ;;  %v1167_v3 = vmov (!%p857_p2), 0.0|0.0   ;;  %vm1168_vm0 = vmmov (!%p857_p2), 0  }
  0x20   : > { %s275_s10 = sadd.s32 %s853_s29, %s273_s28  ;;  %932 = vmatprep.subr.bf16.mxu0 (!%p857_p2), %v1167_v3  ;;  %v933_v4 = vpack.c.bf16 (!%p857_p2), %v292_v1, %v291_v0  ;;  %v294_v5 = vld [vmem:[%s1431_s2 + $0x18] sm:$0xff] (!%p857_p2)  ;;  %v1169_v6 = vmov (!%p857_p2), 0.0   ;;  %vm371_vm1 = vcmask (!%p857_p2), 7168   ;;  %v1170_v7 = vmov (!%p857_p2), -inf  }
  0x21   : > { %s854_s11 = sshll.u32 %s275_s10, 3  ;;  %289 = sbr.rel (%p857_p2) target bundleno = 254 (0xfe), region = 44  ;;  %897 = vmatprep.mubr.msk.f32.mxu0 (!%p857_p2), %vm1168_vm0, %v1169_v6  ;;  %372 = vst.msk [vmem:[#allocation3] sm:$0xff] (!%p857_p2), %vm371_vm1, %v1170_v7  ;;  %373 = vst.msk [vmem:[#allocation4] sm:$0xff] (!%p857_p2), %vm371_vm1, %v1169_v6  ;;  %v936_v8 = vpack.c.bf16 (!%p857_p2), %v294_v5, %v293_v2  ;;  %vm295_vm2 = vcmask (!%p857_p2), 261120   ;;  %vm369_vm3 = vcmask (!%p857_p2), 130048  }
  0x22   : > { %s277_s7 = scalar_lea.vmem %s1429_s0, %s854_s11  ;;  %934 = vmatpush3.bf16.msra.mxu0 (!%p857_p2), %v933_v4  ;;  %374 = vst.msk [vmem:[#allocation5] sm:$0xff] (!%p857_p2), %vm369_vm3, %v1169_v6 }
  0x23   : > { %s281_s6 = scalar_select %p280_p1, %s1141_s21, 1 }
  0x24   : > { %935 = vmatprep.subr.bf16.mxu0 (!%p857_p2), %v1167_v3  ;;  %v290_v9 = vld [vmem:[%s277_s7] sm:$0xff] (!%p857_p2) }
  0x25   : > { %s283_s30 = sadd.s32 %s853_s29, %s281_s6 }
  0x26   : > { %s856_s26 = sshll.u32 %s283_s30, 3  ;;  %937 = vmatpush3.bf16.msra.mxu0 (!%p857_p2), %v936_v8 }
  0x27   : > { %s1309_s15 = scalar_lea.vmem %s1430_s1, %s856_s26 }
  0x29   : > { %898 = vmatmul.mubr.msk.f32.vlgmr.msra.gmra.mrb[0].mxu0 %vm295_vm2, %v290_v9 }
  0xfc   : > { %v365_v10 = vpop.f32.mrb[0].mxu0 }
  0xfd   : > { %370 = vst.msk [vmem:[#allocation2] sm:$0xff] %vm369_vm3, %v365_v10  ;;  %v899_v11 = vpop.f32.mrb[1].mxu0 }
  0xfe PF: > { %v376_v12 = vld [vmem:[%s1432_s3] sm:$0xff]  ;;  %v377_v13 = vld [vmem:[%s1432_s3 + $0x8] sm:$0xff]  ;;  %v378_v14 = vld [vmem:[%s1432_s3 + $0x10] sm:$0xff]  ;;  %v1171_v15 = vmov 0.0|0.0   ;;  %vm1172_vm4 = vmmov 0   ;;  %v1173_v18 = vmov 0.0  }
  0xff   : > { %938 = vmatprep.subr.bf16.mxu0 %v1171_v15  ;;  %v939_v16 = vpack.c.bf16 %v377_v13, %v376_v12  ;;  %v379_v17 = vld [vmem:[%s1432_s3 + $0x18] sm:$0xff]  ;;  %908 = vmatprep.mubr.msk.f32.mxu0 %vm1172_vm4, %v1173_v18  ;;  %v375_v20 = vld [vmem:[%s1309_s15] sm:$0xff]  ;;  %vm380_vm5 = vcmask 261120   ;;  %vm529_vm6 = vcmask 130048   ;;  %v455_v25 = vld [vmem:[%s1433_s4 + $0x8] sm:$0xff]  ;;  %vm607_vm7 = vcmask 64512  }
 0x100   : > { %944 = vmatprep.subr.bf16.mxu1 %v1171_v15  ;;  %919 = vmatprep.mubr.msk.f32.mxu1 %vm1172_vm4, %v1173_v18  ;;  %v942_v19 = vpack.c.bf16 %v379_v17, %v378_v14  ;;  %v454_v24 = vld [vmem:[%s1433_s4] sm:$0xff]  ;;  %v456_v26 = vld [vmem:[%s1433_s4 + $0x10] sm:$0xff]  ;;  %v457_v28 = vld [vmem:[%s1433_s4 + $0x18] sm:$0xff]  ;;  %v1174_v33 = vmov 0   ;;  %vm629_vm8 = vcmask 7168   ;;  %p864_p3 = scmp.ne.s32.totalorder %s1141_s21, 1 }
 0x101   : > { %940 = vmatpush3.bf16.msra.mxu0 %v939_v16  ;;  %v945_v27 = vpack.c.bf16 %v455_v25, %v454_v24  ;;  %v948_v29 = vpack.c.bf16 %v457_v28, %v456_v26  ;;  %1046 = vset.pattern.permute.xlu0 %v1174_v33  ;;  %v606_v34 = vld [vmem:[#allocation3] sm:$0xff]  ;;  %v623_v47 = vld [vmem:[#allocation4] sm:$0xff]  ;;  %v631_v51 = vld [vmem:[#allocation5] sm:$0xff]  ;;  %v1175_v58 = vmov (!%p864_p3), 0  }
 0x102   : > { %941 = vmatprep.subr.bf16.mxu0 %v1171_v15  ;;  %1047 = vset.pattern.permute.xlu1 %v1174_v33 }
 0x103   : > { %946 = vmatpush3.bf16.msra.mxu1 %v945_v27 }
 0x104   : > { %v528_v23 = vld [vmem:[#allocation2] sm:$0xff]  ;;  %947 = vmatprep.subr.bf16.mxu1 %v1171_v15 }
 0x105   : > { %943 = vmatpush3.bf16.msra.mxu0 %v942_v19 }
 0x106   : > { %922 = vmatprep.subr.mxu0 %v1173_v18 }
 0x107   : > { %949 = vmatpush3.bf16.msra.mxu1 %v948_v29 }
 0x108   : > { %909 = vmatmul.mubr.msk.f32.vlgmr.msra.gmra.mrb[0].mxu0 %vm380_vm5, %v375_v20  ;;  %927 = vmatprep.subr.mxu1 %v1173_v18 }
 0x109   : > { %924 = vmatprep.mubr.msk.f32.mxu0 %vm1172_vm4, %v1173_v18 }
 0x10a   : > { %920 = vmatmul.mubr.msk.f32.vlgmr.msra.gmra.mrb[0].mxu1 %vm380_vm5, %v375_v20 }
 0x10b   : > { %929 = vmatprep.mubr.msk.f32.mxu1 %vm1172_vm4, %v1173_v18 }
 0x1db   : > { %v450_v21 = vpop.f32.mrb[0].mxu0 }
 0x1dc   : > { %v910_v22 = vpop.f32.mrb[1].mxu0  ;;  %923 = vmatpush3.xpose.msk.msra.mxu0 %vm529_vm6, %v450_v21 }
 0x1dd   : > { %v524_v38 = vpop.f32.mrb[0].mxu1 }
 0x1de   : > { %v921_v39 = vpop.f32.mrb[1].mxu1  ;;  %928 = vmatpush3.msra.mxu1 %v524_v38 }
 0x1df   : > { %925 = vmatmul.mubr.msk.f32.vlgmr.msra.gmra.mrb[2].mxu0 %vm529_vm6, %v528_v23 }
 0x2b2   : > { %v602_v30 = vpop.f32.mrb[2].mxu0 }
 0x2b3   : > { %v926_v31 = vpop.f32.mrb[3].mxu0  ;;  %v608_v32 = vsel %vm607_vm7, %v602_v30, -inf }
 0x2b4   : > { %609 = vmax.xlane.f32.xlu0 %v608_v32 }
 0x341   : > { %v610_v35 = vpop.xlane.xlu0 %609 }
 0x342   : > { %v611_v36 = vmax.f32 %v606_v34, %v610_v35 }
 0x344   : > { %v612_v37 = vsub.f32 %v606_v34, %v611_v36  ;;  %713 = vst.msk [vmem:[#allocation3] sm:$0xff] %vm629_vm8, %v611_v36  ;;  %617 = vperm.xlu0 %1046, %v611_v36  }
 0x346   : > { %v613_v45 = vmul.f32 1.442695, %v612_v37 }
 0x348   : > { %1052 = vset.pattern.permute.xlu0 (!%p864_p3), %v1175_v58 }
 0x3c3   : > { %v618_v40 = vpop.permute.xlu0 %617 }
 0x3c4   : > { %v620_v41 = vsub.f32 %v602_v30, %v618_v40 }
 0x3c6   : > { %v621_v42 = vmul.f32 1.442695, %v620_v41 }
 0x3c8   : > { %1048 = vpow2.f32 %v621_v42 }
 0x3c9   : > { %1050 = vpow2.f32 %v613_v45 }
 0x3d2   : > { %v1049_v43 = vpop.eup %1048 }
 0x3d3   : > { %930 = vmatmul.mubr.msk.f32.vlgmr.msra.gmra.mrb[2].mxu1 %vm607_vm7, %v1049_v43  ;;  %v625_v44 = vsel %vm607_vm7, %v1049_v43, 0.0  ;;  %v1051_v46 = vpop.eup %1050 }
 0x3d4   : > { %626 = vadd.xlane.f32.xlu1 %v625_v44  ;;  %v624_v48 = vmul.f32 %v1051_v46, %v623_v47 }
 0x3e5   : > { %634 = vperm.xlu1 %1047, %v1051_v46  }
 0x461   : > { %v627_v49 = vpop.xlane.xlu1 %626 }
 0x462   : > { %v628_v50 = vadd.f32 %v627_v49, %v624_v48 }
 0x464   : > { %630 = vst.msk [vmem:[#allocation4] sm:$0xff] %vm629_vm8, %v628_v50 }
 0x465   : > { %v635_v52 = vpop.permute.xlu1 %634 }
 0x466   : > { %v637_v53 = vmul.f32 %v635_v52, %v631_v51 }
 0x46b   : > { %v719_v57 = vld [vmem:[#allocation4] sm:$0xff] (!%p864_p3) }
 0x46c   : > { %1053 = vrcp.f32 (!%p864_p3), %v719_v57 }
 0x476   : > { %v1054_v59 = vpop.eup (!%p864_p3), %1053 }
 0x477   : > { %724 = vperm.xlu0 (!%p864_p3), %1052, %v1054_v59  }
 0x4a3   : > { %717 = sbr.rel (%p864_p3) target bundleno = 1274 (0x4fa), region = 48 }
 0x4a6   : > { %v707_v54 = vpop.f32.mrb[2].mxu1 }
 0x4a7   : > { %v711_v55 = vadd.f32 %v707_v54, %v637_v53  ;;  %v931_v56 = vpop.f32.mrb[3].mxu1 }
 0x4a9   : > { %712 = vst.msk [vmem:[#allocation5] sm:$0xff] %vm529_vm6, %v711_v55 }
 0x4b0   : > { %v718_v60 = vld [vmem:[#allocation5] sm:$0xff] }
 0x4f6   : > { %v725_v61 = vpop.permute.xlu0 %724 }
 0x4f7   : > { %v727_v62 = vmul.f32 %v725_v61, %v718_v60 }
 0x4f9   : > { %728 = vst.msk [vmem:[%s269_s14] sm:$0xff] %vm529_vm6, %v727_v62 }
 0x4fa PF: > { %s866_s21 = sshll.u32 %s1149_s23, 1  ;;  %s745_s30 = sshll.u32 %s269_s14, 4  ;;  %s1372_s30 = int_to_ptr.vmem [resolvable:$true] %s745_s30 }
 0x4fb   : > { %s741_s26 = sadd.s32 %s1145_s22, %s866_s21  ;;  %s1452_s17 = sand.u32 1, %s1133_s19  }
 0x4fc   : > { %s867_s29 = sshll.u32 %s741_s26, 7  ;;  %s730_s28 = scalar_lea.sflag [#allocation7], %s1452_s17 }
 0x4fd   : > { %s743_s7 = scalar_lea.hbm %s1434_s5, %s867_s29  ;;  %s1055_s10 = scalar_lea.vmem %s1372_s30, 128 }
 0x4fe   : > { %p1056_p4 = scmp.ne.s32.totalorder %s1372_s30, %s1055_s10  ;;  %s1176_s22 = smov [#allocation6]  }
 0x4ff   : > { %s1059_s23 = sshll.u32 %s1176_s22, 4  ;;  %s1060_s23 = int_to_ptr.vmem [resolvable:$false] %s1059_s23 }
 0x500   : > { %p1057_p5 = pnand %p1056_p4, %p1269_p6  ;;  %s1061_s14 = scalar_lea.vmem %s1060_s23, 256 }
 0x501   : > { %p1062_p9 = scmp.lt.s32.totalorder %s1372_s30, %s1060_s23  ;;  %p1063_p10 = scmp.lt.s32.totalorder %s1061_s14, %s1055_s10 }
 0x502   : > { %p1058_p8 = pneg %p1057_p5 }
 0x503   : > { %p1064_p11 = por %p1063_p10, %p1062_p9 }
 0x505   : > { %p1065_p12 = pnand %p1064_p11, %p1058_p8 }
 0x507   : > { %1068 = shalt.err (!%p1065_p12)
}
 0x508   : > { %s1069_s16 = scalar_lea.hbm %s743_s7, 128  ;;  %s1073_s6 = scalar_lea.hbm %s1434_s5, 512 }
 0x509   : > { %p1070_p13 = scmp.ne.s32.totalorder %s743_s7, %s1069_s16  ;;  %p1074_p2 = scmp.lt.u32.totalorder %s743_s7, %s1434_s5 }
 0x50a   : > { %p1075_p3 = scmp.lt.u32.totalorder %s1073_s6, %s1069_s16  ;;  %p1077_p5 = scmp.lt.u32.totalorder %s1069_s16, %s743_s7 }
 0x50b   : > { %p1071_p0 = pnand %p1070_p13, %p1269_p6 }
 0x50c   : > { %p1076_p4 = por %p1075_p3, %p1074_p2 }
 0x50d   : > { %p1072_p1 = pneg %p1071_p0 }
 0x50e   : > { %p1078_p9 = por %p1077_p5, %p1076_p4 }
 0x510   : > { %p1079_p8 = pnand %p1078_p9, %p1072_p1 }
 0x512   : > { %1082 = shalt.err (!%p1079_p8)
}
 0x513   : > { %950 = dma.vmem_to_hbm [thread:$0]  (%p1269_p6), %s1372_s30, 128, %s743_s7, %s730_s28  }
 0x514 PF: > { %p956_p10 = scmp.ge.s32.totalorder %s1165_s27, 2  ;;  %s757_s20 = sand.u32 1, %s1129_s18  }
 0x515   : > { %s758_s21 = scalar_lea.sflag [#allocation7], %s757_s20 }
 0x516   : > { %p953_p11 = pnand %p956_p10, %p1276_p7 }
 0x518   : > { %1124 = dma.done.wait (!%p953_p11), %s758_s21, 128  }
 0x519   : > { %1126 = vsyncadd (!%p953_p11), %s758_s21, 4294967168  ;;  %s18_s27 = sadd.s32 1, %s1165_s27   ;;  %s1453_s26 = sld [smem:[#allocation9_spill]] }
 0x51a   : > { %p15_p12 = scmp.ge.s32.totalorder %s18_s27, 10   ;;  %s1454_s20 = sld [smem:[#allocation16_spill]] }
 0x51b   : > { %s1455_s21 = sld [smem:[#allocation10_spill]]  ;;  %s1456_s22 = sld [smem:[#allocation11_spill]] }
 0x51c   : > { %s1457_s23 = sld [smem:[#allocation12_spill]]  ;;  %s1458_s24 = sld [smem:[#allocation13_spill]] }
 0x51d   : > { %s1459_s25 = sld [smem:[#allocation14_spill]]  ;;  %s1460_s8 = sld [smem:[#allocation15_spill]] }
 0x51e   : > { %s1461_s18 = smov %s1133_s19  ;;  %17 = sbr.rel (!%p15_p12) target bundleno = 6 (0x6), region = 86 }
 0x51f   : > { %s1462_s19 = smov %s1453_s26 }
 0x523   : > { %s1463_s26 = smov %s1460_s8 }
 0x525   :  { %763 = vsyncpa [#allocation7], 1 }
 0x526   :  { %765 = vsyncpa [#allocation7 + $0x1], 1 }

</bundles_post_ra>
